<compile_context>
chip_gen: v6e
topology: v6e:2x2x1
jax: 0.10.0
libtpu: 0.0.40
codegen_flags: <defaults>
</compile_context>

<pallas_src>
import jax
import jax.numpy as jnp
from jax import lax
from jax.experimental import pallas as pl
from jax.experimental.pallas import tpu as pltpu


def _score_kernel(u_ref, v_ref, r_ref, o_ref):
    # u_ref, v_ref: (TE, D) gathered src/dst node features for this edge tile
    # r_ref:        (1, D)  learnable weight vector (same block every step)
    # o_ref:        (1, TE) lane-dense per-edge scores for this tile
    prod = u_ref[...].astype(jnp.float32) * v_ref[...].astype(jnp.float32)  # (TE, D) on VPU
    # r-scale + reduce over D on the MXU: (1, D) x (TE, D) contracting the last dims
    # (same lowering pattern as q @ k.T in attention) -> (1, TE) lane-dense row.
    o_ref[...] = lax.dot_general(
        r_ref[...].astype(jnp.float32),
        prod,
        dimension_numbers=(((1,), (1,)), ((), ())),
        preferred_element_type=jnp.float32,
    )


def _round_up(x, m):
    return ((x + m - 1) // m) * m


def score_predictor(h_src, h_dst, src_idx, dst_idx, r, *, edge_tile=512):
    """Compute per-edge scores for the target etype.

    h_src: [N_src, D] features of source-type nodes
    h_dst: [N_dst, D] features of destination-type nodes
    src_idx, dst_idx: [E] int32 endpoint indices of the target-etype edges
    r: [D] learnable weight vector
    Returns: [E] float32 scores.
    """
    E = int(src_idx.shape[0])
    D = int(h_src.shape[1])

    # Tile size: multiple of 128 (lane-dense output), but no larger than needed.
    tile = min(_round_up(edge_tile, 128), _round_up(max(E, 1), 128))
    E_pad = _round_up(max(E, 1), tile)
    num_tiles = E_pad // tile

    # Pad the cheap index vectors (O(E) ints) instead of the big feature arrays:
    # the gather below then directly yields (E_pad, D) arrays with no extra copy.
    if E_pad != E:
        pad = E_pad - E
        src_idx = jnp.pad(src_idx, (0, pad))   # index 0 -> garbage rows, sliced off below
        dst_idx = jnp.pad(dst_idx, (0, pad))

    # Graph glue: gather endpoint features per edge (plain JAX, not the hot path).
    # TODO(synk): fuse this gather into the kernel (scalar-prefetched indices +
    # in-kernel row gather / manual DMA) to remove the u/v HBM round-trip.
    u_feat = jnp.take(h_src, src_idx, axis=0)   # [E_pad, D]
    v_feat = jnp.take(h_dst, dst_idx, axis=0)   # [E_pad, D]

    r2 = r.reshape(1, D)

    cost = pl.CostEstimate(
        flops=3 * E_pad * D,
        transcendentals=0,
        bytes_accessed=2 * E_pad * D * 4 + E_pad * 4 + D * 4,
    )

    out = pl.pallas_call(
        _score_kernel,
        out_shape=jax.ShapeDtypeStruct((1, E_pad), jnp.float32),
        grid_spec=pltpu.PrefetchScalarGridSpec(
            num_scalar_prefetch=0,
            grid=(num_tiles,),
            in_specs=[
                pl.BlockSpec((tile, D), lambda i: (i, 0)),   # u features
                pl.BlockSpec((tile, D), lambda i: (i, 0)),   # v features
                pl.BlockSpec((1, D), lambda i: (0, 0)),      # r (same block every step)
            ],
            out_specs=pl.BlockSpec((1, tile), lambda i: (0, i)),  # lane-dense score row
        ),
        compiler_params=pltpu.CompilerParams(
            dimension_semantics=("parallel",),
        ),
        cost_estimate=cost,
    )(u_feat, v_feat, r2)

    return out[0, :E]   # drop padding -> [E]


def score_predictor_ref(h_src, h_dst, src_idx, dst_idx, r):
    u = jnp.take(h_src, src_idx, axis=0)
    v = jnp.take(h_dst, dst_idx, axis=0)
    return jnp.sum(u * v * r[None, :], axis=-1)


if __name__ == "__main__":
    key = jax.random.PRNGKey(0)
    k1, k2, k3, k4 = jax.random.split(key, 4)

    dim = 32          # feature dim of the module
    n_src = 16        # number of source-type nodes
    n_dst = 16        # number of destination-type nodes
    n_edges = 8       # number of edges of the target etype

    h_src = jax.random.normal(k1, (n_src, dim), dtype=jnp.float32)
    h_dst = jax.random.normal(k2, (n_dst, dim), dtype=jnp.float32)
    src_idx = jax.random.randint(k3, (n_edges,), 0, n_src, dtype=jnp.int32)
    dst_idx = jax.random.randint(k4, (n_edges,), 0, n_dst, dtype=jnp.int32)

    # nn.init.ones_(self.r) -> deterministic ones
    r = jnp.ones((dim,), dtype=jnp.float32)

    scores = score_predictor(h_src, h_dst, src_idx, dst_idx, r)
    scores = jax.block_until_ready(scores)

    ref = score_predictor_ref(h_src, h_dst, src_idx, dst_idx, r)
    assert scores.shape == (n_edges,)
    assert jnp.allclose(scores, ref, atol=1e-5, rtol=1e-5), (scores, ref)

    print("KERNEL_OK")
</pallas_src>

<mosaic_0001>
module attributes {stable_mosaic.version = 11 : i64} {
  func.func @_score_kernel(%arg0: i32, %arg1: memref<128x32xf32, #tpu.memory_space<vmem>>, %arg2: memref<128x32xf32, #tpu.memory_space<vmem>>, %arg3: memref<1x32xf32, #tpu.memory_space<vmem>>, %arg4: memref<1x128xf32, #tpu.memory_space<vmem>>) attributes {dimension_semantics = [#tpu.dimension_semantics<parallel>], iteration_bounds = array<i64: 1>, scalar_prefetch = 0 : i64, scratch_operands = 0 : i64, tpu.core_type = #tpu.core_type<tc>, window_params = [{transform_indices = @transform_0, window_bounds = array<i64: 128, 32>}, {transform_indices = @transform_1, window_bounds = array<i64: 128, 32>}, {pipeline_mode = #tpu.pipeline_mode<synchronous>, transform_indices = @transform_2, window_bounds = array<i64: 1, 32>}, {transform_indices = @transform_3, window_bounds = array<i64: 1, 128>}]} {
    %c0 = arith.constant 0 : index
    %c0_0 = arith.constant 0 : index
    %0 = vector.load %arg1[%c0, %c0_0] : memref<128x32xf32, #tpu.memory_space<vmem>>, vector<128x32xf32>
    %c0_1 = arith.constant 0 : index
    %c0_2 = arith.constant 0 : index
    %1 = vector.load %arg2[%c0_1, %c0_2] : memref<128x32xf32, #tpu.memory_space<vmem>>, vector<128x32xf32>
    %2 = arith.mulf %0, %1 : vector<128x32xf32>
    %c0_3 = arith.constant 0 : index
    %c0_4 = arith.constant 0 : index
    %3 = vector.load %arg3[%c0_3, %c0_4] : memref<1x32xf32, #tpu.memory_space<vmem>>, vector<1x32xf32>
    %cst = arith.constant dense<0.000000e+00> : vector<1x128xf32>
    %4 = tpu.matmul %3, %2, %cst {dimension_numbers = #tpu.dot_dimension_numbers<[1], [1], [0], [0], [0, 0, 1, 0], [], []>} : vector<1x32xf32>, vector<128x32xf32>, vector<1x128xf32> -> vector<1x128xf32>
    %c0_5 = arith.constant 0 : index
    %c0_6 = arith.constant 0 : index
    %5 = vector.load %arg4[%c0_5, %c0_6] : memref<1x128xf32, #tpu.memory_space<vmem>>, vector<1x128xf32>
    tpu.vector_store %arg4[%c0_5, %c0_6], %4 {strides = array<i32>} : memref<1x128xf32, #tpu.memory_space<vmem>>, vector<1x128xf32>,
    return
  }
  func.func @transform_0(%arg0: i32) -> (i32, i32) {
    %c0_i32 = arith.constant 0 : i32
    %c0_i32_0 = arith.constant 0 : i32
    return %arg0, %c0_i32 : i32, i32
  }
  func.func @transform_1(%arg0: i32) -> (i32, i32) {
    %c0_i32 = arith.constant 0 : i32
    %c0_i32_0 = arith.constant 0 : i32
    return %arg0, %c0_i32 : i32, i32
  }
  func.func @transform_2(%arg0: i32) -> (i32, i32) {
    %c0_i32 = arith.constant 0 : i32
    %c0_i32_0 = arith.constant 0 : i32
    %c0_i32_1 = arith.constant 0 : i32
    return %c0_i32, %c0_i32_0 : i32, i32
  }
  func.func @transform_3(%arg0: i32) -> (i32, i32) {
    %c0_i32 = arith.constant 0 : i32
    %c0_i32_0 = arith.constant 0 : i32
    return %c0_i32, %arg0 : i32, i32
  }
}

</mosaic_0001>

<bundles_post_ra>
// kernel: tpu_custom_call.1
= control target key start
LH: loop header
LB: loop body
LE: loop exit
PB: predicated region body
PF: predicated region fallthrough
CT: control target
= control target key end

     0   :  { %vm64_vm0 = vcmask 261120   ;;  %v295_v3 = vmov 0.0   ;;  %vm296_vm1 = vmmov 0   ;;  %s454_s0 = inlined_call_operand.vmem [shape: f32[128,32], index: 0, kind: input, shape index: {}]   ;;  %s455_s1 = inlined_call_operand.vmem [shape: f32[128,32], index: 1, kind: input, shape index: {}]   ;;  %s456_s2 = inlined_call_operand.vmem [shape: f32[1,32], index: 2, kind: input, shape index: {}]   ;;  %s457_s3 = inlined_call_operand.hbm [shape: f32[1,128], index: 3, kind: output, shape index: {}]  }
   0x1   :  { %v30_v0 = vld [vmem:[%s454_s0 + $0x78] sm:$0xff]  ;;  %v29_v2 = vld [vmem:[%s454_s0 + $0x70] sm:$0xff]  ;;  %235 = vmatprep.subr.mxu0 %v295_v3  ;;  %267 = vmatprep.mubr.msk.f32.mxu0 %vm296_vm1, %v295_v3  ;;  %v28_v7 = vld [vmem:[%s454_s0 + $0x68] sm:$0xff] }
   0x2   :  { %v46_v1 = vld [vmem:[%s455_s1 + $0x78] sm:$0xff]  ;;  %v45_v5 = vld [vmem:[%s455_s1 + $0x70] sm:$0xff]  ;;  %v44_v8 = vld [vmem:[%s455_s1 + $0x68] sm:$0xff] }
   0x3   :  { %v62_v4 = vmul.f32 %v46_v1, %v30_v0  ;;  %v61_v6 = vmul.f32 %v45_v5, %v29_v2  ;;  %v60_v9 = vmul.f32 %v44_v8, %v28_v7  ;;  %v27_v10 = vld [vmem:[%s454_s0 + $0x60] sm:$0xff] }
   0x4   :  { %v43_v11 = vld [vmem:[%s455_s1 + $0x60] sm:$0xff] }
   0x5   :  { %236 = vmatpush3.xpose.msk.msra.mxu0 %vm64_vm0, %v62_v4  ;;  %v59_v12 = vmul.f32 %v43_v11, %v27_v10 }
   0x6   :  { %237 = vmatprep.subr.mxu0 %v295_v3 }
   0x9   :  { %238 = vmatpush3.xpose.msk.msra.mxu0 %vm64_vm0, %v61_v6 }
   0xa   :  { %239 = vmatprep.subr.mxu0 %v295_v3 }
   0xd   :  { %240 = vmatpush3.xpose.msk.msra.mxu0 %vm64_vm0, %v60_v9 }
   0xe   :  { %8 = vsyncpa [#allocation3], 0  ;;  %241 = vmatprep.subr.mxu0 %v295_v3  ;;  %v26_v13 = vld [vmem:[%s454_s0 + $0x58] sm:$0xff]  ;;  %v25_v16 = vld [vmem:[%s454_s0 + $0x50] sm:$0xff]  ;;  %s297_s24 = smov [#allocation2]  }
   0xf   :  { %v42_v14 = vld [vmem:[%s455_s1 + $0x58] sm:$0xff]  ;;  %v41_v17 = vld [vmem:[%s455_s1 + $0x50] sm:$0xff]  ;;  %v24_v19 = vld [vmem:[%s454_s0 + $0x48] sm:$0xff]  ;;  %s193_s25 = sshll.u32 %s297_s24, 4  ;;  %s194_s25 = int_to_ptr.vmem [resolvable:$true] %s193_s25 }
  0x10   :  { %v58_v15 = vmul.f32 %v42_v14, %v26_v13  ;;  %v57_v18 = vmul.f32 %v41_v17, %v25_v16  ;;  %v40_v20 = vld [vmem:[%s455_s1 + $0x48] sm:$0xff]  ;;  %v23_v22 = vld [vmem:[%s454_s0 + $0x40] sm:$0xff]  ;;  %v22_v25 = vld [vmem:[%s454_s0 + $0x38] sm:$0xff]  ;;  %p278_p1 = scmp.lt.s32.totalorder %s194_s25, %s194_s25 }
  0x11   :  { %242 = vmatpush3.xpose.msk.msra.mxu0 %vm64_vm0, %v59_v12  ;;  %v56_v21 = vmul.f32 %v40_v20, %v24_v19  ;;  %v39_v23 = vld [vmem:[%s455_s1 + $0x40] sm:$0xff]  ;;  %v38_v26 = vld [vmem:[%s455_s1 + $0x38] sm:$0xff]  ;;  %v21_v28 = vld [vmem:[%s454_s0 + $0x30] sm:$0xff] }
  0x12   :  { %243 = vmatprep.subr.mxu0 %v295_v3  ;;  %v55_v24 = vmul.f32 %v39_v23, %v23_v22  ;;  %v54_v27 = vmul.f32 %v38_v26, %v22_v25  ;;  %v37_v29 = vld [vmem:[%s455_s1 + $0x30] sm:$0xff]  ;;  %v20_v31 = vld [vmem:[%s454_s0 + $0x28] sm:$0xff]  ;;  %v19_v34 = vld [vmem:[%s454_s0 + $0x20] sm:$0xff] }
  0x13   :  { %v53_v30 = vmul.f32 %v37_v29, %v21_v28  ;;  %v36_v32 = vld [vmem:[%s455_s1 + $0x28] sm:$0xff]  ;;  %v35_v35 = vld [vmem:[%s455_s1 + $0x20] sm:$0xff]  ;;  %v18_v37 = vld [vmem:[%s454_s0 + $0x18] sm:$0xff] }
  0x14   :  { %v52_v33 = vmul.f32 %v36_v32, %v20_v31  ;;  %v51_v36 = vmul.f32 %v35_v35, %v19_v34  ;;  %v34_v38 = vld [vmem:[%s455_s1 + $0x18] sm:$0xff]  ;;  %v17_v40 = vld [vmem:[%s454_s0 + $0x10] sm:$0xff]  ;;  %v16_v43 = vld [vmem:[%s454_s0 + $0x8] sm:$0xff] }
  0x15   :  { %244 = vmatpush3.xpose.msk.msra.mxu0 %vm64_vm0, %v58_v15  ;;  %v50_v39 = vmul.f32 %v34_v38, %v18_v37  ;;  %v33_v41 = vld [vmem:[%s455_s1 + $0x10] sm:$0xff]  ;;  %v32_v44 = vld [vmem:[%s455_s1 + $0x8] sm:$0xff]  ;;  %v15_v46 = vld [vmem:[%s454_s0] sm:$0xff]  ;;  %s273_s0 = scalar_lea.vmem %s194_s25, 16 }
  0x16   :  { %245 = vmatprep.subr.mxu0 %v295_v3  ;;  %v49_v42 = vmul.f32 %v33_v41, %v17_v40  ;;  %v48_v45 = vmul.f32 %v32_v44, %v16_v43  ;;  %v31_v47 = vld [vmem:[%s455_s1] sm:$0xff]  ;;  %p274_p0 = scmp.ne.s32.totalorder %s194_s25, %s273_s0  ;;  %s277_s1 = scalar_lea.vmem %s194_s25, 32 }
  0x17   :  { %v47_v48 = vmul.f32 %v31_v47, %v15_v46  ;;  %v63_v49 = vld [vmem:[%s456_s2] sm:$0x1]  ;;  %p279_p2 = scmp.lt.s32.totalorder %s277_s1, %s273_s0 }
  0x19   :  { %246 = vmatpush3.xpose.msk.msra.mxu0 %vm64_vm0, %v57_v18  ;;  %p280_p3 = por %p279_p2, %p278_p1 }
  0x1a   :  { %247 = vmatprep.subr.mxu0 %v295_v3 }
  0x1b   :  { %p281_p4 = pnand %p280_p3, %p274_p0 }
  0x1d   :  { %248 = vmatpush3.xpose.msk.msra.mxu0 %vm64_vm0, %v56_v21 }
  0x1e   :  { %249 = vmatprep.subr.mxu0 %v295_v3 }
  0x21   :  { %250 = vmatpush3.xpose.msk.msra.mxu0 %vm64_vm0, %v55_v24 }
  0x22   :  { %251 = vmatprep.subr.mxu0 %v295_v3 }
  0x25   :  { %252 = vmatpush3.xpose.msk.msra.mxu0 %vm64_vm0, %v54_v27 }
  0x26   :  { %253 = vmatprep.subr.mxu0 %v295_v3 }
  0x29   :  { %254 = vmatpush3.xpose.msk.msra.mxu0 %vm64_vm0, %v53_v30 }
  0x2a   :  { %255 = vmatprep.subr.mxu0 %v295_v3 }
  0x2d   :  { %256 = vmatpush3.xpose.msk.msra.mxu0 %vm64_vm0, %v52_v33 }
  0x2e   :  { %257 = vmatprep.subr.mxu0 %v295_v3 }
  0x31   :  { %258 = vmatpush3.xpose.msk.msra.mxu0 %vm64_vm0, %v51_v36 }
  0x32   :  { %259 = vmatprep.subr.mxu0 %v295_v3 }
  0x35   :  { %260 = vmatpush3.xpose.msk.msra.mxu0 %vm64_vm0, %v50_v39 }
  0x36   :  { %261 = vmatprep.subr.mxu0 %v295_v3 }
  0x39   :  { %262 = vmatpush3.xpose.msk.msra.mxu0 %vm64_vm0, %v49_v42 }
  0x3a   :  { %263 = vmatprep.subr.mxu0 %v295_v3 }
  0x3d   :  { %264 = vmatpush3.xpose.msk.msra.mxu0 %vm64_vm0, %v48_v45 }
  0x3e   :  { %265 = vmatprep.subr.mxu0 %v295_v3 }
  0x41   :  { %266 = vmatpush3.xpose.msk.msra.mxu0 %vm64_vm0, %v47_v48 }
  0x44   :  { %268 = vmatmul.mubr.msk.f32.vlgmr.msra.gmra.mxu0 %vm64_vm0, %v63_v49 }
 0x104   :  { %v182_v50 = vpop.f32.mrf.mxu0 }
 0x105   :  { %186 = vst [vmem:[#allocation2] sm:$0x1] %v182_v50 }
 0x106   :  { %v269_v51 = vpop.f32.mrf.mxu0 }
 0x107   :  { %284 = shalt.err (!%p281_p4)
}
 0x108   :  { %196 = dma.vmem_to_hbm [thread:$0]  %s194_s25, 16, %s457_s3, [#allocation3]  }
 0x109   :  { %293 = dma.done.wait [#allocation3], 16  }
 0x10a   :  { %294 = vsyncadd [#allocation3], 4294967280 }
 0x10b   :  { %200 = vsyncpa [#allocation3], 1 }

</bundles_post_ra>
